<compile_context>
chip_gen: v5e
topology: v5e:2x2
jax: 0.10.0
libtpu: 0.0.40
codegen_flags: <defaults>
</compile_context>

<pallas_src>
import jax
import jax.numpy as jnp
from jax import lax
from jax.experimental import pallas as pl
from jax.experimental.pallas import tpu as pltpu

BN_EPS = 1e-5


def _make_kernel(k, batch, s_tile):
    """k = number of hidden (Linear+BN+ReLU) layers; rows are (b, s), b-major."""

    def kernel(*refs):
        # refs: x, M_0..M_{k-1}, bn_params, out
        x_ref = refs[0]
        m_refs = refs[1:1 + k]
        p_ref = refs[1 + k]
        out_ref = refs[2 + k]

        params = p_ref[...]                      # (2+2k, PW) packed gamma/beta rows

        def bn(h, row):
            # PyTorch BatchNorm1d (training): per-channel stats over the batch axis
            # only (each seq step is an independent GCN forward).  Rows are b-major
            # (row = b*s_tile + s), so the per-step batch sum is a sum of B
            # sublane-aligned row blocks: pure VPU adds + EUP rsqrt, no MXU.
            c_dim = h.shape[1]
            gamma = params[row:row + 1, :c_dim]
            beta = params[row + 1:row + 2, :c_dim]
            parts = [h[b * s_tile:(b + 1) * s_tile, :] for b in range(batch)]
            mean = parts[0]
            for p_ in parts[1:]:
                mean = mean + p_
            mean = mean * (1.0 / batch)
            cparts = [p_ - mean for p_ in parts]
            var = cparts[0] * cparts[0]
            for cp in cparts[1:]:
                var = var + cp * cp
            var = var * (1.0 / batch)            # biased variance, as in torch BN
            scale = lax.rsqrt(var + BN_EPS) * gamma
            return jnp.concatenate([cp * scale + beta for cp in cparts], axis=0)

        h = x_ref[...]                           # (R, N*F), R = batch * s_tile
        h = bn(h, 0)                             # bn_in
        for i in range(k):
            m = m_refs[i][...]
            # Fused "L @ h ; h @ W_i.T" == h @ kron(L.T, W_i.T): one MXU matmul
            # with M = R rows (all seq steps and batch samples folded together).
            h = jnp.dot(h.astype(m.dtype), m, preferred_element_type=jnp.float32)
            h = bn(h, 2 + 2 * i)
            h = jnp.maximum(h, 0.0)              # relu (f32 on all chips)
        out_ref[...] = h.astype(out_ref.dtype)   # single fused lane-dense store

    return kernel


def gcn_seq_layer_forward(x, L, fc_weights, bn_in_gamma, bn_in_beta,
                          bn_gammas, bn_betas, *,
                          s_tile=None, matmul_dtype=None):
    """x: (batch, nodes, seq, features) -> y: (seq, nodes, batch, hidden)."""
    B, N, S, F = x.shape
    H = fc_weights[0].shape[0]
    k = len(fc_weights)
    NF, NH = N * F, N * H
    PW = max(NF, NH)                             # packed BN-param lane width

    # --- grid sizing: fill the MXU M-dimension before ever splitting the grid.
    # A split (2 "parallel" steps, for the 2 v7x TensorCores) is only taken when
    # each half still carries >= 256 rows; otherwise one tile, zero extra grid
    # overhead, no duplicated weight DMAs.
    TARGET_ROWS = 256
    if s_tile is None:
        if S % 2 == 0 and (S // 2) % 8 == 0 and (S // 2) * B >= TARGET_ROWS:
            s_tile = S // 2
        else:
            s_tile = S
    assert S % s_tile == 0, "s_tile must divide seq_len"
    n_tiles = S // s_tile
    R = s_tile * B
    assert n_tiles == 1 or R % 8 == 0, "tiled blocks must be sublane-aligned"

    # --- weight dtype: bf16 only when the kron weights are big enough that DMA /
    # VMEM matter (halves both; f32 accumulation kept via preferred_element_type).
    m_elems = sum(N * (F if i == 0 else H) * NH for i in range(k))
    if matmul_dtype is None:
        matmul_dtype = jnp.bfloat16 if m_elems * 4 > (4 << 20) else jnp.float32
    itemsize = jnp.dtype(matmul_dtype).itemsize

    # --- inputs -------------------------------------------------------------
    # Rows ordered (tile, batch, seq-within-tile): each grid step's row block is
    # contiguous and b-major, so BN batch stats are sums of row blocks in-kernel.
    xt = jnp.transpose(x, (0, 2, 1, 3)).reshape(B, S, NF)        # (B, S, N*F)
    x2d = (xt.reshape(B, n_tiles, s_tile, NF)
             .transpose(1, 0, 2, 3)
             .reshape(S * B, NF)
             .astype(jnp.float32))

    # Per-layer fused operator kron(L.T, W_i.T): (N*in_dim, N*H).
    Ms = [jnp.kron(L.T, W.T).astype(matmul_dtype) for W in fc_weights]

    # Pack all BN affine params into one array: rows [g_in, b_in, g_0, b_0, ...].
    def _pad_row(v):
        v = v.reshape(1, -1).astype(jnp.float32)
        return jnp.pad(v, ((0, 0), (0, PW - v.shape[1])))

    rows = [_pad_row(bn_in_gamma), _pad_row(bn_in_beta)]
    for g, b in zip(bn_gammas, bn_betas):
        rows += [_pad_row(g), _pad_row(b)]
    bn_params = jnp.concatenate(rows, axis=0)                    # (2+2k, PW)

    # --- specs ----------------------------------------------------------------
    in_specs = [pl.BlockSpec((R, NF), lambda t: (t, 0))]                 # acts
    in_specs += [pl.BlockSpec(M.shape, lambda t: (0, 0)) for M in Ms]    # weights
    in_specs += [pl.BlockSpec((2 + 2 * k, PW), lambda t: (0, 0))]        # BN params
    out_spec = pl.BlockSpec((R, NH), lambda t: (t, 0))

    # --- compiler params / VMEM planning ---------------------------------------
    vmem_need = (2 * R * (NF + NH) * 4            # double-buffered act/out blocks
                 + 2 * m_elems * itemsize         # kron weights (default 2 bufs)
                 + 2 * (2 + 2 * k) * PW * 4)      # BN params
    cp_kwargs = dict(
        dimension_semantics=(("parallel",) if n_tiles > 1 else ("arbitrary",)))
    if vmem_need > (16 << 20):
        # Raise the scoped-VMEM limit with headroom; cap at the v7x 64 MiB/core.
        cp_kwargs["vmem_limit_bytes"] = int(min(vmem_need * 5 // 4 + (1 << 20),
                                                64 << 20))

    cost = pl.CostEstimate(
        flops=int(2 * S * B * m_elems + 10 * S * B * (NF + k * NH)),
        transcendentals=int(S * (NF + k * NH)),
        bytes_accessed=int(S * B * (NF + NH) * 4 + m_elems * itemsize
                           + (2 + 2 * k) * PW * 4),
    )

    out2d = pl.pallas_call(
        _make_kernel(k, B, s_tile),
        out_shape=jax.ShapeDtypeStruct((S * B, NH), jnp.float32),
        grid_spec=pltpu.PrefetchScalarGridSpec(
            num_scalar_prefetch=0,
            grid=(n_tiles,),
            in_specs=in_specs,
            out_specs=out_spec,
        ),
        compiler_params=pltpu.CompilerParams(**cp_kwargs),
        cost_estimate=cost,
    )(x2d, *Ms, bn_params)

    # Rows (t, b, s_local) x cols (n, h)  ->  (S, N, B, H), the PyTorch layout.
    return (out2d.reshape(n_tiles, B, s_tile, N, H)
                 .transpose(0, 2, 3, 1, 4)
                 .reshape(S, N, B, H))


def _batchnorm_train_ref(h, gamma, beta):
    mean = jnp.mean(h, axis=0, keepdims=True)
    var = jnp.mean((h - mean) ** 2, axis=0, keepdims=True)
    return (h - mean) * lax.rsqrt(var + BN_EPS) * gamma + beta


def gcn_seq_layer_reference(x, L, fc_weights, bn_in_gamma, bn_in_beta,
                            bn_gammas, bn_betas):
    """Pure-JAX literal transcription of the PyTorch forward (training-mode BN)."""
    B, N, S, F = x.shape
    H = fc_weights[0].shape[0]
    xt = jnp.transpose(x, (2, 1, 0, 3))  # (S, N, B, F)
    ys = []
    gin = bn_in_gamma.reshape(1, -1)
    bin_ = bn_in_beta.reshape(1, -1)
    for s in range(S):
        x_ = xt[s]                                               # (N, B, F)
        xb = jnp.transpose(x_, (1, 0, 2)).reshape(B, N * F)
        xb = _batchnorm_train_ref(xb, gin, bin_)
        h = jnp.transpose(xb.reshape(B, N, F), (1, 0, 2))        # (N, B, F)
        for j, W in enumerate(fc_weights):
            size = F if j == 0 else H
            h = h.reshape(N, B * size)
            h = L @ h
            h = h.reshape(N * B, size)
            h = h @ W.T
            h = h.reshape(N, B, H).transpose(1, 0, 2).reshape(B, N * H)
            h = _batchnorm_train_ref(h, bn_gammas[j].reshape(1, -1),
                                     bn_betas[j].reshape(1, -1))
            h = jnp.maximum(h.reshape(B, N, H).transpose(1, 0, 2), 0.0)
        ys.append(h)
    return jnp.stack(ys, axis=0)                                 # (S, N, B, H)


if __name__ == "__main__":
    # Small shapes consistent with the module.
    B, N, S, F, H = 2, 4, 8, 4, 32      # batch, nodes_n, seq_len, features_n, hidden
    layers_n = 3
    k = layers_n - 1

    key = jax.random.PRNGKey(0)
    keys = jax.random.split(key, k + 1)
    x = jax.random.normal(keys[0], (B, N, S, F), dtype=jnp.float32)

    # Deterministic Laplacian of a ring graph on N nodes: L = D - A.
    A = jnp.roll(jnp.eye(N, dtype=jnp.float32), 1, axis=1) + \
        jnp.roll(jnp.eye(N, dtype=jnp.float32), -1, axis=1)
    L = 2.0 * jnp.eye(N, dtype=jnp.float32) - A

    # Linear weights: init.uniform_ -> U[0, 1), no bias.
    fc_weights = []
    for i in range(k):
        in_dim = F if i == 0 else H
        fc_weights.append(jax.random.uniform(keys[i + 1], (H, in_dim),
                                             dtype=jnp.float32))

    # BatchNorm1d affine params at their PyTorch defaults (weight=1, bias=0).
    bn_in_gamma = jnp.ones((N * F,), jnp.float32)
    bn_in_beta = jnp.zeros((N * F,), jnp.float32)
    bn_gammas = [jnp.ones((N * H,), jnp.float32) for _ in range(k)]
    bn_betas = [jnp.zeros((N * H,), jnp.float32) for _ in range(k)]
    # TODO(synk): BatchNorm1d running_mean/running_var buffer updates are training
    # side effects that do not affect this forward output; not modeled.

    y = gcn_seq_layer_forward(x, L, fc_weights, bn_in_gamma, bn_in_beta,
                              bn_gammas, bn_betas)
    y = jax.block_until_ready(y)

    y_ref = gcn_seq_layer_reference(x, L, fc_weights, bn_in_gamma, bn_in_beta,
                                    bn_gammas, bn_betas)
    assert y.shape == (S, N, B, H), y.shape
    assert jnp.allclose(y, y_ref, atol=1e-4, rtol=1e-4), "mismatch vs reference"
    print("KERNEL_OK")
</pallas_src>

<mosaic_0001>
module attributes {stable_mosaic.version = 11 : i64} {
  func.func @kernel(%arg0: i32, %arg1: memref<16x16xf32, #tpu.memory_space<vmem>>, %arg2: memref<16x128xf32, #tpu.memory_space<vmem>>, %arg3: memref<128x128xf32, #tpu.memory_space<vmem>>, %arg4: memref<6x128xf32, #tpu.memory_space<vmem>>, %arg5: memref<16x128xf32, #tpu.memory_space<vmem>>) attributes {dimension_semantics = [#tpu.dimension_semantics<arbitrary>], iteration_bounds = array<i64: 1>, scalar_prefetch = 0 : i64, scratch_operands = 0 : i64, tpu.core_type = #tpu.core_type<tc>, window_params = [{transform_indices = @transform_0, window_bounds = array<i64: 16, 16>}, {pipeline_mode = #tpu.pipeline_mode<synchronous>, transform_indices = @transform_1, window_bounds = array<i64: 16, 128>}, {pipeline_mode = #tpu.pipeline_mode<synchronous>, transform_indices = @transform_2, window_bounds = array<i64: 128, 128>}, {pipeline_mode = #tpu.pipeline_mode<synchronous>, transform_indices = @transform_3, window_bounds = array<i64: 6, 128>}, {transform_indices = @transform_4, window_bounds = array<i64: 16, 128>}]} {
    %c0 = arith.constant 0 : index
    %c0_0 = arith.constant 0 : index
    %0 = vector.load %arg4[%c0, %c0_0] : memref<6x128xf32, #tpu.memory_space<vmem>>, vector<6x128xf32>
    %c0_1 = arith.constant 0 : index
    %c0_2 = arith.constant 0 : index
    %1 = vector.load %arg1[%c0_1, %c0_2] : memref<16x16xf32, #tpu.memory_space<vmem>>, vector<16x16xf32>
    %2 = vector.extract_strided_slice %0 {offsets = [0, 0], sizes = [1, 16], strides = [1, 1]} : vector<6x128xf32> to vector<1x16xf32>
    %3 = vector.extract_strided_slice %0 {offsets = [1, 0], sizes = [1, 16], strides = [1, 1]} : vector<6x128xf32> to vector<1x16xf32>
    %4 = vector.extract_strided_slice %1 {offsets = [0, 0], sizes = [8, 16], strides = [1, 1]} : vector<16x16xf32> to vector<8x16xf32>
    %5 = vector.extract_strided_slice %1 {offsets = [8, 0], sizes = [8, 16], strides = [1, 1]} : vector<16x16xf32> to vector<8x16xf32>
    %6 = arith.addf %4, %5 : vector<8x16xf32>
    %cst = arith.constant 5.000000e-01 : f32
    %7 = vector.broadcast %cst : f32 to vector<8x16xf32>
    %8 = arith.mulf %6, %7 : vector<8x16xf32>
    %9 = arith.subf %4, %8 : vector<8x16xf32>
    %10 = arith.subf %5, %8 : vector<8x16xf32>
    %11 = arith.mulf %9, %9 : vector<8x16xf32>
    %12 = arith.mulf %10, %10 : vector<8x16xf32>
    %13 = arith.addf %11, %12 : vector<8x16xf32>
    %cst_3 = arith.constant 5.000000e-01 : f32
    %14 = vector.broadcast %cst_3 : f32 to vector<8x16xf32>
    %15 = arith.mulf %13, %14 : vector<8x16xf32>
    %cst_4 = arith.constant 9.99999974E-6 : f32
    %16 = vector.broadcast %cst_4 : f32 to vector<8x16xf32>
    %17 = arith.addf %15, %16 : vector<8x16xf32>
    %18 = math.rsqrt %17 : vector<8x16xf32>
    %19 = vector.broadcast %2 : vector<1x16xf32> to vector<8x16xf32>
    %20 = arith.mulf %18, %19 : vector<8x16xf32>
    %21 = arith.mulf %9, %20 : vector<8x16xf32>
    %22 = vector.broadcast %3 : vector<1x16xf32> to vector<8x16xf32>
    %23 = arith.addf %21, %22 : vector<8x16xf32>
    %24 = arith.mulf %10, %20 : vector<8x16xf32>
    %25 = vector.broadcast %3 : vector<1x16xf32> to vector<8x16xf32>
    %26 = arith.addf %24, %25 : vector<8x16xf32>
    %27 = tpu.concatenate %23, %26 in 0 : vector<8x16xf32>, vector<8x16xf32> -> vector<16x16xf32>
    %c0_5 = arith.constant 0 : index
    %c0_6 = arith.constant 0 : index
    %28 = vector.load %arg2[%c0_5, %c0_6] : memref<16x128xf32, #tpu.memory_space<vmem>>, vector<16x128xf32>
    %cst_7 = arith.constant dense<0.000000e+00> : vector<16x128xf32>
    %29 = tpu.matmul %27, %28, %cst_7 {dimension_numbers = #tpu.dot_dimension_numbers<[1], [0], [0], [1], [0, 0, 1, 1], [], []>} : vector<16x16xf32>, vector<16x128xf32>, vector<16x128xf32> -> vector<16x128xf32>
    %30 = vector.extract_strided_slice %0 {offsets = [2, 0], sizes = [1, 128], strides = [1, 1]} : vector<6x128xf32> to vector<1x128xf32>
    %31 = vector.extract_strided_slice %0 {offsets = [3, 0], sizes = [1, 128], strides = [1, 1]} : vector<6x128xf32> to vector<1x128xf32>
    %32 = vector.extract_strided_slice %29 {offsets = [0, 0], sizes = [8, 128], strides = [1, 1]} : vector<16x128xf32> to vector<8x128xf32>
    %33 = vector.extract_strided_slice %29 {offsets = [8, 0], sizes = [8, 128], strides = [1, 1]} : vector<16x128xf32> to vector<8x128xf32>
    %34 = arith.addf %32, %33 : vector<8x128xf32>
    %cst_8 = arith.constant 5.000000e-01 : f32
    %35 = vector.broadcast %cst_8 : f32 to vector<8x128xf32>
    %36 = arith.mulf %34, %35 : vector<8x128xf32>
    %37 = arith.subf %32, %36 : vector<8x128xf32>
    %38 = arith.subf %33, %36 : vector<8x128xf32>
    %39 = arith.mulf %37, %37 : vector<8x128xf32>
    %40 = arith.mulf %38, %38 : vector<8x128xf32>
    %41 = arith.addf %39, %40 : vector<8x128xf32>
    %cst_9 = arith.constant 5.000000e-01 : f32
    %42 = vector.broadcast %cst_9 : f32 to vector<8x128xf32>
    %43 = arith.mulf %41, %42 : vector<8x128xf32>
    %cst_10 = arith.constant 9.99999974E-6 : f32
    %44 = vector.broadcast %cst_10 : f32 to vector<8x128xf32>
    %45 = arith.addf %43, %44 : vector<8x128xf32>
    %46 = math.rsqrt %45 : vector<8x128xf32>
    %47 = vector.broadcast %30 : vector<1x128xf32> to vector<8x128xf32>
    %48 = arith.mulf %46, %47 : vector<8x128xf32>
    %49 = arith.mulf %37, %48 : vector<8x128xf32>
    %50 = vector.broadcast %31 : vector<1x128xf32> to vector<8x128xf32>
    %51 = arith.addf %49, %50 : vector<8x128xf32>
    %52 = arith.mulf %38, %48 : vector<8x128xf32>
    %53 = vector.broadcast %31 : vector<1x128xf32> to vector<8x128xf32>
    %54 = arith.addf %52, %53 : vector<8x128xf32>
    %55 = tpu.concatenate %51, %54 in 0 : vector<8x128xf32>, vector<8x128xf32> -> vector<16x128xf32>
    %cst_11 = arith.constant 0.000000e+00 : f32
    %56 = vector.broadcast %cst_11 : f32 to vector<16x128xf32>
    %57 = arith.maximumf %55, %56 : vector<16x128xf32>
    %c0_12 = arith.constant 0 : index
    %c0_13 = arith.constant 0 : index
    %58 = vector.load %arg3[%c0_12, %c0_13] : memref<128x128xf32, #tpu.memory_space<vmem>>, vector<128x128xf32>
    %cst_14 = arith.constant dense<0.000000e+00> : vector<16x128xf32>
    %59 = tpu.matmul %57, %58, %cst_14 {dimension_numbers = #tpu.dot_dimension_numbers<[1], [0], [0], [1], [0, 0, 1, 1], [], []>} : vector<16x128xf32>, vector<128x128xf32>, vector<16x128xf32> -> vector<16x128xf32>
    %60 = vector.extract_strided_slice %0 {offsets = [4, 0], sizes = [1, 128], strides = [1, 1]} : vector<6x128xf32> to vector<1x128xf32>
    %61 = vector.extract_strided_slice %0 {offsets = [5, 0], sizes = [1, 128], strides = [1, 1]} : vector<6x128xf32> to vector<1x128xf32>
    %62 = vector.extract_strided_slice %59 {offsets = [0, 0], sizes = [8, 128], strides = [1, 1]} : vector<16x128xf32> to vector<8x128xf32>
    %63 = vector.extract_strided_slice %59 {offsets = [8, 0], sizes = [8, 128], strides = [1, 1]} : vector<16x128xf32> to vector<8x128xf32>
    %64 = arith.addf %62, %63 : vector<8x128xf32>
    %cst_15 = arith.constant 5.000000e-01 : f32
    %65 = vector.broadcast %cst_15 : f32 to vector<8x128xf32>
    %66 = arith.mulf %64, %65 : vector<8x128xf32>
    %67 = arith.subf %62, %66 : vector<8x128xf32>
    %68 = arith.subf %63, %66 : vector<8x128xf32>
    %69 = arith.mulf %67, %67 : vector<8x128xf32>
    %70 = arith.mulf %68, %68 : vector<8x128xf32>
    %71 = arith.addf %69, %70 : vector<8x128xf32>
    %cst_16 = arith.constant 5.000000e-01 : f32
    %72 = vector.broadcast %cst_16 : f32 to vector<8x128xf32>
    %73 = arith.mulf %71, %72 : vector<8x128xf32>
    %cst_17 = arith.constant 9.99999974E-6 : f32
    %74 = vector.broadcast %cst_17 : f32 to vector<8x128xf32>
    %75 = arith.addf %73, %74 : vector<8x128xf32>
    %76 = math.rsqrt %75 : vector<8x128xf32>
    %77 = vector.broadcast %60 : vector<1x128xf32> to vector<8x128xf32>
    %78 = arith.mulf %76, %77 : vector<8x128xf32>
    %79 = arith.mulf %67, %78 : vector<8x128xf32>
    %80 = vector.broadcast %61 : vector<1x128xf32> to vector<8x128xf32>
    %81 = arith.addf %79, %80 : vector<8x128xf32>
    %82 = arith.mulf %68, %78 : vector<8x128xf32>
    %83 = vector.broadcast %61 : vector<1x128xf32> to vector<8x128xf32>
    %84 = arith.addf %82, %83 : vector<8x128xf32>
    %85 = tpu.concatenate %81, %84 in 0 : vector<8x128xf32>, vector<8x128xf32> -> vector<16x128xf32>
    %cst_18 = arith.constant 0.000000e+00 : f32
    %86 = vector.broadcast %cst_18 : f32 to vector<16x128xf32>
    %87 = arith.maximumf %85, %86 : vector<16x128xf32>
    %c0_19 = arith.constant 0 : index
    %c0_20 = arith.constant 0 : index
    %88 = vector.load %arg5[%c0_19, %c0_20] : memref<16x128xf32, #tpu.memory_space<vmem>>, vector<16x128xf32>
    tpu.vector_store %arg5[%c0_19, %c0_20], %87 {strides = array<i32>} : memref<16x128xf32, #tpu.memory_space<vmem>>, vector<16x128xf32>,
    return
  }
  func.func @transform_0(%arg0: i32) -> (i32, i32) {
    %c0_i32 = arith.constant 0 : i32
    %c0_i32_0 = arith.constant 0 : i32
    return %arg0, %c0_i32 : i32, i32
  }
  func.func @transform_1(%arg0: i32) -> (i32, i32) {
    %c0_i32 = arith.constant 0 : i32
    %c0_i32_0 = arith.constant 0 : i32
    %c0_i32_1 = arith.constant 0 : i32
    return %c0_i32, %c0_i32_0 : i32, i32
  }
  func.func @transform_2(%arg0: i32) -> (i32, i32) {
    %c0_i32 = arith.constant 0 : i32
    %c0_i32_0 = arith.constant 0 : i32
    %c0_i32_1 = arith.constant 0 : i32
    return %c0_i32, %c0_i32_0 : i32, i32
  }
  func.func @transform_3(%arg0: i32) -> (i32, i32) {
    %c0_i32 = arith.constant 0 : i32
    %c0_i32_0 = arith.constant 0 : i32
    %c0_i32_1 = arith.constant 0 : i32
    return %c0_i32, %c0_i32_0 : i32, i32
  }
  func.func @transform_4(%arg0: i32) -> (i32, i32) {
    %c0_i32 = arith.constant 0 : i32
    %c0_i32_0 = arith.constant 0 : i32
    return %arg0, %c0_i32 : i32, i32
  }
}

</mosaic_0001>

<bundles_post_ra>
// kernel: tpu_custom_call.1
= control target key start
LH: loop header
LB: loop body
LE: loop exit
PB: predicated region body
PF: predicated region fallthrough
CT: control target
= control target key end

     0   :  { %9 = vsyncpa [#allocation3], 0  ;;  %s484_s0 = inlined_call_operand.hbm [shape: f32[16,16], index: 0, kind: input, shape index: {}]   ;;  %s485_s1 = inlined_call_operand.hbm [shape: f32[16,128], index: 1, kind: input, shape index: {}]   ;;  %s486_s2 = inlined_call_operand.hbm [shape: f32[128,128], index: 2, kind: input, shape index: {}]   ;;  %s487_s3 = inlined_call_operand.hbm [shape: f32[6,128], index: 3, kind: input, shape index: {}]   ;;  %s488_s4 = inlined_call_operand.hbm [shape: f32[16,128], index: 4, kind: output, shape index: {}]  }
   0x1   :  { %10 = vsyncpa [#allocation6], 0 }
   0x2   :  { %11 = vsyncpa [#allocation9], 0 }
   0x3   :  { %12 = vsyncpa [#allocation4], 0  ;;  %s30_s17 = sshll.u32 %s485_s1, 4  ;;  %s417_s18 = smov [#allocation5]   ;;  %s31_s17 = int_to_ptr.hbm [resolvable:$true] %s30_s17 }
   0x4   :  { %s32_s19 = sshll.u32 %s417_s18, 4  ;;  %s17_s22 = sshll.u32 %s484_s0, 4  ;;  %s33_s19 = int_to_ptr.vmem [resolvable:$true] %s32_s19  ;;  %s18_s22 = int_to_ptr.hbm [resolvable:$true] %s17_s22 }
   0x5   :  { %s418_s23 = smov 128   ;;  %s419_s24 = smov 8  }
   0x6   :  { %38 = dma.hbm_to_vmem [thread:$0]  %s31_s17, 256, %s33_s19, [#allocation6], %s418_s23, %s418_s23, %s419_s24  }
   0x7   :  { %s420_s25 = smov [#allocation2]   ;;  %s43_s1 = sshll.u32 %s486_s2, 4  ;;  %s44_s1 = int_to_ptr.hbm [resolvable:$true] %s43_s1 }
   0x8   :  { %s19_s26 = sshll.u32 %s420_s25, 4  ;;  %s57_s30 = sshll.u32 %s487_s3, 4  ;;  %s20_s26 = int_to_ptr.vmem [resolvable:$true] %s19_s26  ;;  %s58_s30 = int_to_ptr.hbm [resolvable:$true] %s57_s30 }
   0x9   :  { %25 = dma.hbm_to_vmem [thread:$0]  %s18_s22, 256, %s20_s26, [#allocation3], %s418_s23, %s418_s23, %s419_s24  }
   0xa   :  { %s421_s5 = smov [#allocation7]   ;;  %s422_s7 = smov [#allocation8]  }
   0xb   :  { %s45_s6 = sshll.u32 %s421_s5, 4  ;;  %s59_s2 = sshll.u32 %s422_s7, 4  ;;  %s46_s6 = int_to_ptr.vmem [resolvable:$true] %s45_s6  ;;  %s60_s2 = int_to_ptr.vmem [resolvable:$true] %s59_s2 }
   0xc   :  { %51 = dma.hbm_to_vmem [thread:$0]  %s44_s1, 2048, %s46_s6, [#allocation6], %s418_s23, %s418_s23, %s419_s24  }
   0xd   :  { %62 = dma.hbm_to_vmem [thread:$0]  %s58_s30, 128, %s60_s2, [#allocation9]  }
   0xe   :  { %409 = dma.done.wait [#allocation3], 256  }
   0xf   :  { %410 = vsyncadd [#allocation3], 4294967040 }
  0x10   :  { %411 = dma.done.wait [#allocation6], 2304  }
  0x11   :  { %412 = vsyncadd [#allocation6], 4294964992 }
  0x12   :  { %413 = dma.done.wait [#allocation9], 128  }
  0x13   :  { %414 = vsyncadd [#allocation9], 4294967168  ;;  %v109_v0 = vld [vmem:[#allocation5 + $0x8] sm:$0xff]  ;;  %v108_v1 = vld [vmem:[#allocation5] sm:$0xff]  ;;  %vm110_vm3 = vcmask 130048   ;;  %s423_s3 = smov [#allocation10]  }
  0x14   :  { %131 = vmatpush.msra.mxu0 %v109_v0  ;;  %v80_v2 = vld [vmem:[#allocation2] sm:$0xff]  ;;  %v81_v3 = vld [vmem:[#allocation2 + $0x8] sm:$0xff]  ;;  %v183_v28 = vld [vmem:[#allocation7 + $0x78] sm:$0xff]  ;;  %s241_s8 = sshll.u32 %s423_s3, 4  ;;  %s243_s11 = sshll.u32 %s488_s4, 4  ;;  %s242_s8 = int_to_ptr.vmem [resolvable:$true] %s241_s8  ;;  %s244_s11 = int_to_ptr.hbm [resolvable:$true] %s243_s11 }
  0x15   :  { %v82_v4 = vadd.f32 %v81_v3, %v80_v2  ;;  %v470_v16 = vld [vmem:[#allocation8] sm:$0x3f]  ;;  %184 = vmatpush.msra.mxu1 %v183_v28  ;;  %260 = vmatpush.msra.mxu2 %v183_v28  ;;  %v182_v29 = vld [vmem:[#allocation7 + $0x70] sm:$0xff]  ;;  %v181_v30 = vld [vmem:[#allocation7 + $0x68] sm:$0xff] }
  0x16   :  { %132 = vmatpush.msra.mxu0 %v108_v1  ;;  %v101_v19 = vperm.slane %v470_v16, 0  ;;  %v104_v23 = vperm.slane %v470_v16, 1  ;;  %v180_v31 = vld [vmem:[#allocation7 + $0x60] sm:$0xff]  ;;  %v179_v32 = vld [vmem:[#allocation7 + $0x58] sm:$0xff]  ;;  %v178_v33 = vld [vmem:[#allocation7 + $0x50] sm:$0xff]  ;;  %v159_v60 = vperm.slane %v470_v16, 2 }
  0x17   :  { %v83_v5 = vmul.f32 0.5, %v82_v4  ;;  %185 = vmatpush.msra.mxu1 %v182_v29  ;;  %261 = vmatpush.msra.mxu2 %v182_v29  ;;  %v177_v34 = vld [vmem:[#allocation7 + $0x48] sm:$0xff]  ;;  %v176_v35 = vld [vmem:[#allocation7 + $0x40] sm:$0xff]  ;;  %v175_v37 = vld [vmem:[#allocation7 + $0x38] sm:$0xff]  ;;  %v162_v0 = vperm.slane %v470_v16, 3  ;;  %v229_v28 = vperm.slane %v470_v16, 5 }
  0x18   :  { %v174_v38 = vld [vmem:[#allocation7 + $0x30] sm:$0xff]  ;;  %v173_v39 = vld [vmem:[#allocation7 + $0x28] sm:$0xff]  ;;  %v172_v40 = vld [vmem:[#allocation7 + $0x20] sm:$0xff] }
  0x19   :  { %v84_v6 = vsub.f32 %v80_v2, %v83_v5  ;;  %v85_v7 = vsub.f32 %v81_v3, %v83_v5  ;;  %186 = vmatpush.msra.mxu1 %v181_v30  ;;  %262 = vmatpush.msra.mxu2 %v181_v30  ;;  %v171_v43 = vld [vmem:[#allocation7 + $0x18] sm:$0xff]  ;;  %v170_v45 = vld [vmem:[#allocation7 + $0x10] sm:$0xff]  ;;  %v169_v46 = vld [vmem:[#allocation7 + $0x8] sm:$0xff] }
  0x1a   :  { %v168_v49 = vld [vmem:[#allocation7] sm:$0xff] }
  0x1b   :  { %v86_v8 = vmul.f32 %v84_v6, %v84_v6  ;;  %v87_v9 = vmul.f32 %v85_v7, %v85_v7  ;;  %187 = vmatpush.msra.mxu1 %v180_v31  ;;  %263 = vmatpush.msra.mxu2 %v180_v31 }
  0x1d   :  { %v88_v10 = vadd.f32 %v87_v9, %v86_v8  ;;  %188 = vmatpush.msra.mxu1 %v179_v32  ;;  %264 = vmatpush.msra.mxu2 %v179_v32 }
  0x1f   :  { %v89_v11 = vmul.f32 0.5, %v88_v10  ;;  %189 = vmatpush.msra.mxu1 %v178_v33  ;;  %265 = vmatpush.msra.mxu2 %v178_v33 }
  0x21   :  { %v90_v12 = vadd.f32 1e-05, %v89_v11  ;;  %190 = vmatpush.msra.mxu1 %v177_v34  ;;  %266 = vmatpush.msra.mxu2 %v177_v34 }
  0x23   :  { %283 = vrsqrt.f32 %v90_v12  ;;  %vm97_vm0 = vweird.f32 %v90_v12  ;;  %191 = vmatpush.msra.mxu1 %v176_v35  ;;  %267 = vmatpush.msra.mxu2 %v176_v35 }
  0x25   :  { %192 = vmatpush.msra.mxu1 %v175_v37  ;;  %268 = vmatpush.msra.mxu2 %v175_v37 }
  0x27   :  { %193 = vmatpush.msra.mxu1 %v174_v38  ;;  %269 = vmatpush.msra.mxu2 %v174_v38 }
  0x29   :  { %v284_v13 = vpop.eup %283  ;;  %194 = vmatpush.msra.mxu1 %v173_v39  ;;  %270 = vmatpush.msra.mxu2 %v173_v39 }
  0x2a   :  { %v92_v14 = vmul.f32 %v284_v13, %v90_v12  ;;  %vm98_vm1 = vweird.f32 %v284_v13 }
  0x2b   :  { %vm99_vm2 = vmor %vm97_vm0, %vm98_vm1  ;;  %195 = vmatpush.msra.mxu1 %v172_v40  ;;  %271 = vmatpush.msra.mxu2 %v172_v40 }
  0x2c   :  { %v93_v15 = vmul.f32 %v284_v13, %v92_v14 }
  0x2d   :  { %196 = vmatpush.msra.mxu1 %v171_v43  ;;  %272 = vmatpush.msra.mxu2 %v171_v43 }
  0x2e   :  { %v94_v17 = vmul.f32 0.5, %v93_v15 }
  0x2f   :  { %197 = vmatpush.msra.mxu1 %v170_v45  ;;  %273 = vmatpush.msra.mxu2 %v170_v45 }
  0x30   :  { %v95_v18 = vsub.f32 1.5, %v94_v17 }
  0x31   :  { %198 = vmatpush.msra.mxu1 %v169_v46  ;;  %274 = vmatpush.msra.mxu2 %v169_v46 }
  0x32   :  { %v96_v20 = vmul.f32 %v284_v13, %v95_v18 }
  0x33   :  { %199 = vmatpush.msra.mxu1 %v168_v49  ;;  %275 = vmatpush.msra.mxu2 %v168_v49 }
  0x34   :  { %v100_v21 = vsel %vm99_vm2, %v284_v13, %v96_v20 }
  0x35   :  { %v102_v22 = vmul.f32 %v101_v19, %v100_v21 }
  0x37   :  { %v103_v24 = vmul.f32 %v102_v22, %v84_v6  ;;  %v106_v26 = vmul.f32 %v102_v22, %v85_v7 }
  0x39   :  { %v105_v25 = vadd.f32 %v104_v23, %v103_v24  ;;  %v107_v27 = vadd.f32 %v106_v26, %v104_v23  ;;  %v226_v24 = vperm.slane %v470_v16, 4 }
  0x3b   :  { %258 = vmatmul.msk.f32.vlgmr.msra.gmra.mxu0 %vm110_vm3, %v105_v25 }
  0x43   :  { %259 = vmatmul.msk.f32.gmra.mxu0 %vm110_vm3, %v107_v27 }
  0xb8   :  { %v134_v36 = vpop.f32.mrf.mxu0 }
  0xc0   :  { %v137_v41 = vpop.f32.mrf.mxu0 }
  0xc1   :  { %v140_v42 = vadd.f32 %v137_v41, %v134_v36 }
  0xc3   :  { %v141_v44 = vmul.f32 0.5, %v140_v42 }
  0xc5   :  { %v142_v47 = vsub.f32 %v134_v36, %v141_v44  ;;  %v143_v48 = vsub.f32 %v137_v41, %v141_v44 }
  0xc7   :  { %v144_v50 = vmul.f32 %v142_v47, %v142_v47  ;;  %v145_v51 = vmul.f32 %v143_v48, %v143_v48 }
  0xc9   :  { %v146_v52 = vadd.f32 %v145_v51, %v144_v50 }
  0xcb   :  { %v147_v53 = vmul.f32 0.5, %v146_v52 }
  0xcd   :  { %v148_v54 = vadd.f32 1e-05, %v147_v53 }
  0xcf   :  { %285 = vrsqrt.f32 %v148_v54  ;;  %vm155_vm5 = vweird.f32 %v148_v54 }
  0xd5   :  { %v286_v55 = vpop.eup %285 }
  0xd6   :  { %v150_v56 = vmul.f32 %v286_v55, %v148_v54  ;;  %vm156_vm4 = vweird.f32 %v286_v55 }
  0xd7   :  { %vm157_vm6 = vmor %vm155_vm5, %vm156_vm4 }
  0xd8   :  { %v151_v57 = vmul.f32 %v286_v55, %v150_v56 }
  0xda   :  { %v152_v58 = vmul.f32 0.5, %v151_v57 }
  0xdc   :  { %v153_v59 = vsub.f32 1.5, %v152_v58 }
  0xde   :  { %v154_v61 = vmul.f32 %v286_v55, %v153_v59 }
  0xe0   :  { %v158_v62 = vsel %vm157_vm6, %v286_v55, %v154_v61 }
  0xe1   :  { %v160_v63 = vmul.f32 %v159_v60, %v158_v62 }
  0xe3   :  { %v164_v1 = vmul.f32 %v160_v63, %v143_v48  ;;  %v161_v2 = vmul.f32 %v160_v63, %v142_v47 }
  0xe5   :  { %v163_v3 = vadd.f32 %v162_v0, %v161_v2  ;;  %v165_v4 = vadd.f32 %v164_v1, %v162_v0 }
  0xe7   :  { %v166_v5 = vmax.f32 %v163_v3, 0.0  ;;  %v167_v6 = vmax.f32 %v165_v4, 0.0 }
  0xe9   :  { %200 = vmatmul.f32.vlgmr.msra.gmra.mxu1 %v166_v5  ;;  %203 = vmatmul.f32.vlgmr.msra.gmra.mxu2 %v167_v6 }
 0x166   :  { %v201_v7 = vpop.f32.mrf.mxu1 }
 0x16c   :  { %v204_v8 = vpop.f32.mrf.mxu2 }
 0x16d   :  { %v207_v9 = vadd.f32 %v204_v8, %v201_v7 }
 0x16f   :  { %v208_v10 = vmul.f32 0.5, %v207_v9 }
 0x171   :  { %v209_v11 = vsub.f32 %v201_v7, %v208_v10  ;;  %v210_v12 = vsub.f32 %v204_v8, %v208_v10 }
 0x173   :  { %v211_v13 = vmul.f32 %v209_v11, %v209_v11  ;;  %v212_v14 = vmul.f32 %v210_v12, %v210_v12 }
 0x175   :  { %v213_v15 = vadd.f32 %v212_v14, %v211_v13 }
 0x177   :  { %v214_v17 = vmul.f32 0.5, %v213_v15 }
 0x179   :  { %v215_v18 = vadd.f32 1e-05, %v214_v17 }
 0x17b   :  { %287 = vrsqrt.f32 %v215_v18  ;;  %vm222_vm8 = vweird.f32 %v215_v18 }
 0x181   :  { %v288_v19 = vpop.eup %287 }
 0x182   :  { %v217_v20 = vmul.f32 %v288_v19, %v215_v18  ;;  %vm223_vm7 = vweird.f32 %v288_v19 }
 0x183   :  { %vm224_vm9 = vmor %vm222_vm8, %vm223_vm7 }
 0x184   :  { %v218_v21 = vmul.f32 %v288_v19, %v217_v20 }
 0x186   :  { %v219_v22 = vmul.f32 0.5, %v218_v21 }
 0x188   :  { %v220_v23 = vsub.f32 1.5, %v219_v22 }
 0x18a   :  { %v221_v25 = vmul.f32 %v288_v19, %v220_v23 }
 0x18c   :  { %v225_v26 = vsel %vm224_vm9, %v288_v19, %v221_v25 }
 0x18d   :  { %v227_v27 = vmul.f32 %v226_v24, %v225_v26 }
 0x18f   :  { %v228_v29 = vmul.f32 %v227_v27, %v209_v11  ;;  %v231_v30 = vmul.f32 %v227_v27, %v210_v12 }
 0x191   :  { %v230_v31 = vadd.f32 %v229_v28, %v228_v29  ;;  %v232_v32 = vadd.f32 %v231_v30, %v229_v28 }
 0x193   :  { %v233_v33 = vmax.f32 %v230_v31, 0.0  ;;  %v234_v34 = vmax.f32 %v232_v32, 0.0 }
 0x195   :  { %235 = vst [vmem:[#allocation10] sm:$0xff] %v233_v33 }
 0x196   :  { %236 = vst [vmem:[#allocation10 + $0x8] sm:$0xff] %v234_v34 }
 0x197   :  { %249 = dma.vmem_to_hbm [thread:$0]  %s242_s8, 256, %s244_s11, [#allocation4], %s418_s23, %s418_s23, %s419_s24  }
 0x198   :  { %415 = dma.done.wait [#allocation4], 256  }
 0x199   :  { %416 = vsyncadd [#allocation4], 4294967040 }
 0x19a   :  { %254 = vsyncpa [#allocation3], 1 }
 0x19b   :  { %255 = vsyncpa [#allocation6], 1 }
 0x19c   :  { %256 = vsyncpa [#allocation9], 1 }
 0x19d   :  { %257 = vsyncpa [#allocation4], 1 }

</bundles_post_ra>
